<compile_context>
chip_gen: v5e
topology: v5e:2x2
jax: 0.10.0
libtpu: 0.0.40
codegen_flags: <defaults>
</compile_context>

<pallas_src>
import functools

import jax
import jax.numpy as jnp
from jax.experimental import pallas as pl
from jax.experimental.pallas import tpu as pltpu

LANE = 128          # vreg lane width
SUBLANE = 8         # f32 vreg sublane count
MAX_TILE_ROWS = 2048  # (2048, 128) f32 tile = 1 MiB; 2 in x 2 buf = 4 MiB VMEM
NUM_CORES = 2       # leading "parallel" grid axis (megacore split on v7x)


def _charbonnier_kernel(x_ref, y_ref, out_ref, *, eps, n_valid, tile_rows,
                        blocks_per_core):
    c = pl.program_id(0)   # parallel (core) axis
    i = pl.program_id(1)   # sequential reduction axis

    # out_ref is the per-core resident (8, 128) partial-sum accumulator.
    @pl.when(i == 0)
    def _():
        out_ref[...] = jnp.zeros_like(out_ref)

    x = x_ref[...].astype(jnp.float32)
    y = y_ref[...].astype(jnp.float32)
    d = x - y
    val = jnp.sqrt(d * d + eps)

    tile_elems = tile_rows * LANE
    # Logical (un-clamped) flat-element offset of this grid step.
    # (int32 index math; fine for < 2^31 elements.)
    base = (c * blocks_per_core + i) * tile_elems

    # Fast path: block lies entirely inside the valid element range.
    @pl.when(base + tile_elems <= n_valid)
    def _():
        out_ref[...] += jnp.sum(
            val.reshape(tile_rows // SUBLANE, SUBLANE, LANE), axis=0)

    # Slow path (at most a couple of grid steps total): block straddles or
    # lies past the valid range -> mask padded / out-of-bounds elements.
    @pl.when(base + tile_elems > n_valid)
    def _():
        row = jax.lax.broadcasted_iota(jnp.int32, (tile_rows, LANE), 0)
        lane = jax.lax.broadcasted_iota(jnp.int32, (tile_rows, LANE), 1)
        idx = base + row * LANE + lane
        masked = jnp.where(idx < n_valid, val, 0.0)
        out_ref[...] += jnp.sum(
            masked.reshape(tile_rows // SUBLANE, SUBLANE, LANE), axis=0)


def charbonnier_loss(x, y, eps=1e-06):
    assert x.shape == y.shape
    n = x.size
    assert n > 0

    block_elems = SUBLANE * LANE  # 1024: one f32 (8, 128) vreg worth
    xf = x.reshape(-1)
    yf = y.reshape(-1)
    n_pad = ((n + block_elems - 1) // block_elems) * block_elems
    if n_pad != n:
        # Only ragged sizes (not a multiple of 1024) take this one-off pad
        # copy; typical NCHW image tensors skip it entirely.
        xf = jnp.pad(xf, (0, n_pad - n))
        yf = jnp.pad(yf, (0, n_pad - n))

    rows = n_pad // LANE                 # multiple of SUBLANE
    tile_rows = min(MAX_TILE_ROWS, rows)  # multiple of SUBLANE, <= rows
    xf = xf.reshape(rows, LANE)
    yf = yf.reshape(rows, LANE)

    total_blocks = pl.cdiv(rows, tile_rows)
    bpc = pl.cdiv(total_blocks, NUM_CORES)   # blocks per core
    grid = (NUM_CORES, bpc)

    # Clamp phantom block indices (when total_blocks is odd) to a real block;
    # the kernel fully masks their contribution via `base >= n_valid`.
    def in_map(c, i):
        return (jnp.minimum(c * bpc + i, total_blocks - 1), 0)

    kernel = functools.partial(
        _charbonnier_kernel,
        eps=float(eps),
        n_valid=int(n),
        tile_rows=tile_rows,
        blocks_per_core=bpc,
    )

    partials = pl.pallas_call(
        kernel,
        out_shape=jax.ShapeDtypeStruct((NUM_CORES * SUBLANE, LANE),
                                       jnp.float32),
        grid_spec=pltpu.PrefetchScalarGridSpec(
            num_scalar_prefetch=0,
            grid=grid,
            in_specs=[
                pl.BlockSpec((tile_rows, LANE), in_map),
                pl.BlockSpec((tile_rows, LANE), in_map),
            ],
            out_specs=pl.BlockSpec((SUBLANE, LANE), lambda c, i: (c, 0)),
        ),
        compiler_params=pltpu.CompilerParams(
            dimension_semantics=("parallel", "arbitrary")),
    )(xf, yf)

    # Tiny final cross-lane reduction of the (2*8, 128) partial sums.
    return jnp.sum(partials) / jnp.float32(n)


def _reference(x, y, eps=1e-06):
    d = x - y
    return jnp.mean(jnp.sqrt(d * d + eps))


if __name__ == "__main__":
    key = jax.random.PRNGKey(0)

    # Primary case: NCHW like the PyTorch module's inputs.
    kx, ky, key = (*jax.random.split(key, 2), key)
    shape = (2, 4, 16, 16)
    x = jax.random.normal(kx, shape, dtype=jnp.float32)
    y = jax.random.normal(ky, shape, dtype=jnp.float32)
    loss = jax.block_until_ready(charbonnier_loss(x, y, eps=1e-06))
    ref = _reference(x, y, eps=1e-06)
    assert jnp.allclose(loss, ref, rtol=1e-5, atol=1e-6), (loss, ref)

    # Ragged case: exercises the padded / masked tail path.
    kx2, ky2 = jax.random.split(jax.random.PRNGKey(1))
    shape2 = (1, 3, 17, 19)
    x2 = jax.random.normal(kx2, shape2, dtype=jnp.float32)
    y2 = jax.random.normal(ky2, shape2, dtype=jnp.float32)
    loss2 = jax.block_until_ready(charbonnier_loss(x2, y2, eps=1e-06))
    ref2 = _reference(x2, y2, eps=1e-06)
    assert jnp.allclose(loss2, ref2, rtol=1e-5, atol=1e-6), (loss2, ref2)

    # Multi-block case: exercises both grid axes / the parallel split.
    kx3, ky3 = jax.random.split(jax.random.PRNGKey(2))
    shape3 = (2, 16, 128, 128)
    x3 = jax.random.normal(kx3, shape3, dtype=jnp.float32)
    y3 = jax.random.normal(ky3, shape3, dtype=jnp.float32)
    loss3 = jax.block_until_ready(charbonnier_loss(x3, y3, eps=1e-06))
    ref3 = _reference(x3, y3, eps=1e-06)
    assert jnp.allclose(loss3, ref3, rtol=1e-5, atol=1e-6), (loss3, ref3)

    print("KERNEL_OK")
</pallas_src>

<mosaic_0001>
module attributes {stable_mosaic.version = 11 : i64} {
  func.func @_charbonnier_kernel(%arg0: i32, %arg1: i32, %arg2: memref<16x128xf32, #tpu.memory_space<vmem>>, %arg3: memref<16x128xf32, #tpu.memory_space<vmem>>, %arg4: memref<8x128xf32, #tpu.memory_space<vmem>>) attributes {dimension_semantics = [#tpu.dimension_semantics<parallel>, #tpu.dimension_semantics<arbitrary>], iteration_bounds = array<i64: 2, 1>, scalar_prefetch = 0 : i64, scratch_operands = 0 : i64, tpu.core_type = #tpu.core_type<tc>, window_params = [{transform_indices = @transform_0, window_bounds = array<i64: 16, 128>}, {transform_indices = @transform_1, window_bounds = array<i64: 16, 128>}, {transform_indices = @transform_2, window_bounds = array<i64: 8, 128>}]} {
    %c0_i32 = arith.constant 0 : i32
    %0 = arith.cmpi eq, %arg1, %c0_i32 : i32
    %1 = arith.extui %0 : i1 to i32
    %c0_i32_0 = arith.constant 0 : i32
    %2 = arith.cmpi ne, %1, %c0_i32_0 : i32
    scf.if %2 {
      %cst_10 = arith.constant 0.000000e+00 : f32
      %21 = vector.broadcast %cst_10 : f32 to vector<8x128xf32>
      %c0_11 = arith.constant 0 : index
      %c0_12 = arith.constant 0 : index
      %22 = vector.load %arg4[%c0_11, %c0_12] : memref<8x128xf32, #tpu.memory_space<vmem>>, vector<8x128xf32>
      tpu.vector_store %arg4[%c0_11, %c0_12], %21 {strides = array<i32>} : memref<8x128xf32, #tpu.memory_space<vmem>>, vector<8x128xf32>,
    } else {
    }
    %c0 = arith.constant 0 : index
    %c0_1 = arith.constant 0 : index
    %3 = vector.load %arg2[%c0, %c0_1] : memref<16x128xf32, #tpu.memory_space<vmem>>, vector<16x128xf32>
    %c0_2 = arith.constant 0 : index
    %c0_3 = arith.constant 0 : index
    %4 = vector.load %arg3[%c0_2, %c0_3] : memref<16x128xf32, #tpu.memory_space<vmem>>, vector<16x128xf32>
    %5 = arith.subf %3, %4 : vector<16x128xf32>
    %6 = arith.mulf %5, %5 : vector<16x128xf32>
    %cst = arith.constant 9.99999997E-7 : f32
    %7 = vector.broadcast %cst : f32 to vector<16x128xf32>
    %8 = arith.addf %6, %7 : vector<16x128xf32>
    %9 = math.sqrt %8 : vector<16x128xf32>
    %c1_i32 = arith.constant 1 : i32
    %10 = arith.muli %arg0, %c1_i32 : i32
    %11 = arith.addi %10, %arg1 : i32
    %c2048_i32 = arith.constant 2048 : i32
    %12 = arith.muli %11, %c2048_i32 : i32
    %c2048_i32_4 = arith.constant 2048 : i32
    %13 = arith.addi %12, %c2048_i32_4 : i32
    %c2048_i32_5 = arith.constant 2048 : i32
    %14 = arith.cmpi sle, %13, %c2048_i32_5 : i32
    %15 = arith.extui %14 : i1 to i32
    %c0_i32_6 = arith.constant 0 : i32
    %16 = arith.cmpi ne, %15, %c0_i32_6 : i32
    scf.if %16 {
      %c0_10 = arith.constant 0 : index
      %c0_11 = arith.constant 0 : index
      %21 = vector.load %arg4[%c0_10, %c0_11] : memref<8x128xf32, #tpu.memory_space<vmem>>, vector<8x128xf32>
      %22 = vector.shape_cast %9 : vector<16x128xf32> to vector<2x8x128xf32>
      %cst_12 = arith.constant dense<0.000000e+00> : vector<8x128xf32>
      %23 = vector.multi_reduction <add>, %22, %cst_12 [0] : vector<2x8x128xf32> to vector<8x128xf32>
      %24 = arith.addf %21, %23 : vector<8x128xf32>
      %c0_13 = arith.constant 0 : index
      %c0_14 = arith.constant 0 : index
      %25 = vector.load %arg4[%c0_13, %c0_14] : memref<8x128xf32, #tpu.memory_space<vmem>>, vector<8x128xf32>
      tpu.vector_store %arg4[%c0_13, %c0_14], %24 {strides = array<i32>} : memref<8x128xf32, #tpu.memory_space<vmem>>, vector<8x128xf32>,
    } else {
    }
    %c2048_i32_7 = arith.constant 2048 : i32
    %17 = arith.addi %12, %c2048_i32_7 : i32
    %c2048_i32_8 = arith.constant 2048 : i32
    %18 = arith.cmpi sgt, %17, %c2048_i32_8 : i32
    %19 = arith.extui %18 : i1 to i32
    %c0_i32_9 = arith.constant 0 : i32
    %20 = arith.cmpi ne, %19, %c0_i32_9 : i32
    scf.if %20 {
      %21 = tpu.iota {dimensions = array<i32: 0>} : vector<16x128xi32>
      %22 = tpu.iota {dimensions = array<i32: 1>} : vector<16x128xi32>
      %c128_i32 = arith.constant 128 : i32
      %23 = vector.broadcast %c128_i32 : i32 to vector<16x128xi32>
      %24 = arith.muli %21, %23 : vector<16x128xi32>
      %25 = vector.broadcast %12 : i32 to vector<16x128xi32>
      %26 = arith.addi %25, %24 : vector<16x128xi32>
      %27 = arith.addi %26, %22 : vector<16x128xi32>
      %c2048_i32_10 = arith.constant 2048 : i32
      %28 = vector.broadcast %c2048_i32_10 : i32 to vector<16x128xi32>
      %29 = arith.cmpi slt, %27, %28 : vector<16x128xi32>
      %cst_11 = arith.constant 0.000000e+00 : f32
      %30 = vector.broadcast %cst_11 : f32 to vector<16x128xf32>
      %31 = arith.select %29, %9, %30 : vector<16x128xi1>, vector<16x128xf32>
      %c0_12 = arith.constant 0 : index
      %c0_13 = arith.constant 0 : index
      %32 = vector.load %arg4[%c0_12, %c0_13] : memref<8x128xf32, #tpu.memory_space<vmem>>, vector<8x128xf32>
      %33 = vector.shape_cast %31 : vector<16x128xf32> to vector<2x8x128xf32>
      %cst_14 = arith.constant dense<0.000000e+00> : vector<8x128xf32>
      %34 = vector.multi_reduction <add>, %33, %cst_14 [0] : vector<2x8x128xf32> to vector<8x128xf32>
      %35 = arith.addf %32, %34 : vector<8x128xf32>
      %c0_15 = arith.constant 0 : index
      %c0_16 = arith.constant 0 : index
      %36 = vector.load %arg4[%c0_15, %c0_16] : memref<8x128xf32, #tpu.memory_space<vmem>>, vector<8x128xf32>
      tpu.vector_store %arg4[%c0_15, %c0_16], %35 {strides = array<i32>} : memref<8x128xf32, #tpu.memory_space<vmem>>, vector<8x128xf32>,
    } else {
    }
    return
  }
  func.func @transform_0(%arg0: i32, %arg1: i32) -> (i32, i32) {
    %c1_i32 = arith.constant 1 : i32
    %0 = arith.muli %arg0, %c1_i32 : i32
    %1 = arith.addi %0, %arg1 : i32
    %c0_i32 = arith.constant 0 : i32
    %2 = arith.minsi %1, %c0_i32 : i32
    %c0_i32_0 = arith.constant 0 : i32
    %c0_i32_1 = arith.constant 0 : i32
    return %2, %c0_i32_0 : i32, i32
  }
  func.func @transform_1(%arg0: i32, %arg1: i32) -> (i32, i32) {
    %c1_i32 = arith.constant 1 : i32
    %0 = arith.muli %arg0, %c1_i32 : i32
    %1 = arith.addi %0, %arg1 : i32
    %c0_i32 = arith.constant 0 : i32
    %2 = arith.minsi %1, %c0_i32 : i32
    %c0_i32_0 = arith.constant 0 : i32
    %c0_i32_1 = arith.constant 0 : i32
    return %2, %c0_i32_0 : i32, i32
  }
  func.func @transform_2(%arg0: i32, %arg1: i32) -> (i32, i32) {
    %c0_i32 = arith.constant 0 : i32
    %c0_i32_0 = arith.constant 0 : i32
    return %arg0, %c0_i32 : i32, i32
  }
}

</mosaic_0001>

<bundles_post_ra>
// kernel: tpu_custom_call.1
= control target key start
LH: loop header
LB: loop body
LE: loop exit
PB: predicated region body
PF: predicated region fallthrough
CT: control target
= control target key end

     0   :  { %7 = vsyncpa [#allocation3], 0  ;;  %s934_s0 = inlined_call_operand.hbm [shape: f32[16,128], index: 0, kind: input, shape index: {}]   ;;  %s935_s1 = inlined_call_operand.hbm [shape: f32[16,128], index: 1, kind: input, shape index: {}]   ;;  %s936_s2 = inlined_call_operand.hbm [shape: f32[16,128], index: 2, kind: output, shape index: {}]  }
   0x1   :  { %9 = vsyncpa [#allocation3 + $0x1], 0 }
   0x2   :  { %10 = vsyncpa [#allocation6], 0 }
   0x3   :  { %12 = vsyncpa [#allocation6 + $0x1], 0 }
   0x4   :  { %13 = vsyncpa [#allocation4], 0 }
   0x5   :  { %15 = vsyncpa [#allocation4 + $0x1], 0  ;;  %s745_s9 = smov 0   ;;  %s747_s10 = smov 0  }
   0x6   :  { %s749_s11 = smov 0   ;;  %s751_s12 = smov 0  }
   0x7   :  { %s753_s13 = smov 0   ;;  %s755_s14 = smov 0  }
   0x8   :  { %s757_s15 = smov 0   ;;  %s759_s16 = smov 0  }
   0x9 LB: > { %s435_s17 = sadd.s32 4294967295, %s723_s16   ;;  %s436_s18 = sadd.s32 4294967294, %s723_s16   ;;  %s723_s16 = sphi %s759_s16, %s21_s16   ;;  %s719_s15 = sphi %s757_s15, %s948_s15   ;;  %s715_s14 = sphi %s755_s14, %s947_s14   ;;  %s711_s13 = sphi %s753_s13, %s924_s13   ;;  %s707_s12 = sphi %s751_s12, %s946_s12   ;;  %s703_s11 = sphi %s749_s11, %s945_s11   ;;  %s699_s10 = sphi %s747_s10, %s944_s10   ;;  %s695_s9 = sphi %s745_s9, %s943_s9  }
   0xa   : > { %s33_s19 = sadd.s32 1, %s719_s15  ;;  %p692_p1 = scmp.ne.s32.totalorder %s711_s13, 0 }
   0xb   : > { %p35_p0 = scmp.ge.s32.totalorder %s33_s19, 2  ;;  %p54_p2 = scmp.eq.s32.totalorder %s723_s16, 0 }
   0xc   : > { %p59_p3 = scmp.ne.s32.totalorder %s711_s13, %s707_s12  ;;  %p60_p5 = scmp.eq.s32.totalorder %s435_s17, 0 }
   0xd   : > { %s950_s19 = smov (%p35_p0, %s33_s19), 0  ;;  %p791_p4 = por %p692_p1, %p54_p2 }
   0xe   : > { %p795_p6 = por %p60_p5, %p59_p3  ;;  %s101_s22 = ssub.s32 %s719_s15, %s950_s19 }
   0xf   : > { %p102_p7 = scmp.eq.s32.totalorder %s101_s22, 0  ;;  %s104_s23 = sadd.s32 1, %s703_s11 }
  0x10   : > { %p114_p8 = scmp.ne.s32.totalorder %s703_s11, %s699_s10  ;;  %p115_p9 = scmp.eq.s32.totalorder %s435_s17, 1 }
  0x11   : > { %s803_s24 = scalar_select %p102_p7, %s703_s11, %s104_s23  }
  0x12   : > { %p120_p10 = scmp.ne.s32.totalorder %s699_s10, %s695_s9  ;;  %p121_p11 = scmp.eq.s32.totalorder %s436_s18, 1 }
  0x13   : > { %p809_p12 = por %p115_p9, %p114_p8  ;;  %p438_p13 = scmp.ge.s32.totalorder %s723_s16, 2 }
  0x14   : > { %p814_p0 = por %p121_p11, %p120_p10  ;;  %p475_p1 = scmp.lt.s32.totalorder %s723_s16, 2 }
  0x15   : > { %s154_s29 = sshll.u32 %s934_s0, 4  ;;  %s725_s30 = smov [#allocation2]   ;;  %s155_s29 = int_to_ptr.hbm [resolvable:$true] %s154_s29 }
  0x16   : > { %s156_s3 = sshll.u32 %s725_s30, 4  ;;  %p824_p2 = pnand %p475_p1, %p791_p4  ;;  %s157_s3 = int_to_ptr.vmem [resolvable:$true] %s156_s3 }
  0x17   : > { %p445_p3 = scmp.ge.s32.totalorder %s723_s16, 1  ;;  %p189_p5 = scmp.lt.s32.totalorder %s723_s16, 3 }
  0x18   : > { %s556_s5 = sshra.s32 %s155_s29, 4  ;;  %p560_p8 = pneg %p824_p2  ;;  %s557_s5 = int_to_ptr.hbm [resolvable:$true] %s556_s5 }
  0x19   : > { %s558_s6 = scalar_lea.hbm %s557_s5, 16  ;;  %s563_s12 = scalar_lea.hbm %s934_s0, 16 }
  0x1a   : > { %p559_p7 = scmp.ne.s32.totalorder %s557_s5, %s558_s6  ;;  %p565_p4 = scmp.lt.s32.totalorder %s563_s12, %s558_s6 }
  0x1c   : > { %p561_p9 = pnand %p560_p8, %p559_p7 }
  0x1e   : > { %p562_p10 = pneg %p561_p9 }
  0x20   : > { %p567_p11 = pnand %p565_p4, %p562_p10 }
  0x22   : > { %570 = shalt.err (!%p567_p11)
}
  0x23   : > { %s726_s17 = smov 128   ;;  %s727_s18 = smov 8  }
  0x24   : > { %467 = dma.hbm_to_vmem [thread:$0]  (!%p824_p2), %s155_s29, 256, %s157_s3, [#allocation3], %s726_s17, %s726_s17, %s727_s18  }
  0x25   : > { %p844_p1 = pnand %p445_p3, %p189_p5  ;;  %s179_s27 = sshll.u32 %s935_s1, 4  ;;  %s180_s27 = int_to_ptr.hbm [resolvable:$true] %s179_s27 }
  0x26   : > { %s728_s28 = smov [#allocation5]   ;;  %s586_s5 = sshra.s32 %s180_s27, 4  ;;  %s587_s5 = int_to_ptr.hbm [resolvable:$true] %s586_s5 }
  0x27   : > { %s181_s30 = sshll.u32 %s728_s28, 4  ;;  %s588_s6 = scalar_lea.hbm %s587_s5, 16  ;;  %s182_s30 = int_to_ptr.vmem [resolvable:$true] %s181_s30 }
  0x28   : > { %p589_p7 = scmp.ne.s32.totalorder %s587_s5, %s588_s6  ;;  %s593_s7 = scalar_lea.hbm %s935_s1, 16 }
  0x29   : > { %p595_p3 = scmp.lt.s32.totalorder %s593_s7, %s588_s6 }
  0x2a   : > { %p591_p9 = pnand %p589_p7, %p560_p8 }
  0x2c   : > { %p592_p10 = pneg %p591_p9 }
  0x2e   : > { %p597_p5 = pnand %p595_p3, %p592_p10 }
  0x30   : > { %600 = shalt.err (!%p597_p5)
}
  0x31   : > { %470 = dma.hbm_to_vmem [thread:$0]  (!%p824_p2), %s180_s27, 256, %s182_s30, [#allocation6], %s726_s17, %s726_s17, %s727_s18  }
  0x32   : > { %193 = sbr.rel (%p844_p1) target bundleno = 134 (0x86), region = 28  ;;  %s195_s8 = sand.u32 (!%p844_p1), 1, %s711_s13  }
  0x33   : > { %s446_s12 = sshll.u32 (!%p844_p1), %s195_s8, 4  ;;  %s196_s22 = scalar_lea.sflag (!%p844_p1), [#allocation3], %s195_s8 }
  0x34   : > { %s199_s23 = scalar_lea.vmem (!%p844_p1), [#allocation2], %s446_s12 }
  0x37   : > { %681 = dma.done.wait (%p795_p6), %s196_s22, 256  }
  0x38   : > { %683 = vsyncadd (%p795_p6), %s196_s22, 4294967040  ;;  %s206_s28 = scalar_lea.sflag [#allocation6], %s195_s8  ;;  %s209_s5 = scalar_lea.vmem [#allocation5], %s446_s12 }
  0x39   : > { %685 = dma.done.wait (%p795_p6), %s206_s28, 256  }
  0x3a   : > { %687 = vsyncadd (%p795_p6), %s206_s28, 4294967040  ;;  %s233_s4 = sand.u32 1, %s699_s10   ;;  %s449_s17 = sshll.u32 %s715_s14, 11  ;;  %v729_v0 = vmov 0.0   ;;  %v249_v1 = vld [vmem:[%s199_s23] sm:$0xff]  ;;  %v250_v2 = vld [vmem:[%s199_s23 + $0x8] sm:$0xff] }
  0x3b   : > { %s448_s18 = sshll.u32 %s233_s4, 3  ;;  %s876_s20 = sadd.s32 2048, %s449_s17  ;;  %v251_v3 = vld [vmem:[%s209_s5] sm:$0xff]  ;;  %v252_v4 = vld [vmem:[%s209_s5 + $0x8] sm:$0xff] }
  0x3c   : > { %s878_s27 = scalar_lea.vmem [#allocation7], %s448_s18  ;;  %v253_v5 = vsub.f32 %v249_v1, %v251_v3  ;;  %v254_v6 = vsub.f32 %v250_v2, %v252_v4  ;;  %p450_p6 = scmp.gt.s32.totalorder %s876_s20, 2048 }
  0x3d   : > { %248 = vst [vmem:[%s878_s27] sm:$0xff] %v729_v0 }
  0x3e   : > { %v255_v7 = vmul.f32 %v253_v5, %v253_v5  ;;  %v256_v8 = vmul.f32 %v254_v6, %v254_v6 }
  0x40   : > { %v257_v9 = vadd.f32 1e-06, %v255_v7  ;;  %v258_v10 = vadd.f32 1e-06, %v256_v8 }
  0x42   : > { %552 = vrsqrt.f32 %v257_v9  ;;  %vm266_vm0 = vcmp.eq.f32.partialorder %v257_v9, inf  ;;  %v269_v22 = vand.u32 2147483648, %v257_v9  ;;  %vm268_vm1 = vcmp.eq.f32.partialorder %v257_v9, 0.0 }
  0x43   : > { %554 = vrsqrt.f32 %v258_v10  ;;  %vm278_vm2 = vcmp.eq.f32.partialorder %v258_v10, inf  ;;  %v281_v25 = vand.u32 2147483648, %v258_v10  ;;  %vm280_vm3 = vcmp.eq.f32.partialorder %v258_v10, 0.0 }
  0x48   : > { %v553_v11 = vpop.eup %552 }
  0x49   : > { %v555_v12 = vpop.eup %554  ;;  %v260_v13 = vmul.f32 %v553_v11, %v257_v9 }
  0x4a   : > { %v272_v14 = vmul.f32 %v555_v12, %v258_v10 }
  0x4b   : > { %v261_v15 = vmul.f32 %v553_v11, %v260_v13 }
  0x4c   : > { %v273_v16 = vmul.f32 %v555_v12, %v272_v14 }
  0x4d   : > { %v262_v17 = vmul.f32 0.5, %v261_v15 }
  0x4e   : > { %v274_v18 = vmul.f32 0.5, %v273_v16 }
  0x4f   : > { %v263_v19 = vsub.f32 1.5, %v262_v17 }
  0x50   : > { %v275_v20 = vsub.f32 1.5, %v274_v18 }
  0x51   : > { %v264_v21 = vmul.f32 %v553_v11, %v263_v19 }
  0x52   : > { %v276_v23 = vmul.f32 %v555_v12, %v275_v20 }
  0x53   : > { %v265_v24 = vmul.f32 %v264_v21, %v257_v9  ;;  %289 = sbr.rel (%p450_p6) target bundleno = 93 (0x5d), region = 44 }
  0x54   : > { %v277_v26 = vmul.f32 %v276_v23, %v258_v10 }
  0x55   : > { %v267_v27 = vsel %vm266_vm0, %v257_v9, %v265_v24 }
  0x56   : > { %v270_v28 = vsel %vm268_vm1, %v269_v22, %v267_v27  ;;  %v279_v29 = vsel %vm278_vm2, %v258_v10, %v277_v26 }
  0x57   : > { %v282_v30 = vsel %vm280_vm3, %v281_v25, %v279_v29 }
  0x58   : > { %v290_v31 = vld [vmem:[%s878_s27] sm:$0xff]  ;;  %v291_v32 = vadd.f32 %v282_v30, %v270_v28 }
  0x5a   : > { %v292_v33 = vadd.f32 %v291_v32, %v290_v31 }
  0x5c   : > { %293 = vst [vmem:[%s878_s27] sm:$0xff] %v292_v33 }
  0x5d PF: > { %p451_p2 = scmp.le.s32.totalorder %s876_s20, 2048 }
  0x5f   : > { %297 = sbr.rel (%p451_p2) target bundleno = 119 (0x77), region = 48 }
  0x64   : > { %v298_v34 = vlaneseq  ;;  %v305_v36 = vstv %s449_s17  ;;  %v314_v47 = vld [vmem:[%s878_s27] sm:$0xff] }
  0x66   : > { %v299_v35 = vshrl.u32 %v298_v34, 7  ;;  %v302_v38 = vand.u32 127, %v298_v34 }
  0x68   : > { %v300_v37 = vadd.s32 8, %v299_v35  ;;  %v303_v39 = vmul.u32 128, %v299_v35 }
  0x6a   : > { %v304_v40 = vmul.u32 128, %v300_v37  ;;  %v306_v41 = vadd.s32 %v305_v36, %v303_v39 }
  0x6c   : > { %v307_v42 = vadd.s32 %v305_v36, %v304_v40  ;;  %v308_v43 = vadd.s32 %v306_v41, %v302_v38 }
  0x6e   : > { %v309_v44 = vadd.s32 %v307_v42, %v302_v38  ;;  %vm310_vm4 = vcmp.lt.s32.totalorder %v308_v43, 2048 }
  0x6f   : > { %v312_v45 = vsel %vm310_vm4, %v270_v28, 0.0 }
  0x70   : > { %vm311_vm5 = vcmp.lt.s32.totalorder %v309_v44, 2048 }
  0x71   : > { %v313_v46 = vsel %vm311_vm5, %v282_v30, 0.0 }
  0x72   : > { %v315_v48 = vadd.f32 %v313_v46, %v312_v45 }
  0x74   : > { %v316_v49 = vadd.f32 %v315_v48, %v314_v47 }
  0x76   : > { %317 = vst [vmem:[%s878_s27] sm:$0xff] %v316_v49 }
  0x77 PF: > { %s453_s21 = sshll.u32 %s715_s14, 3  ;;  %s331_s3 = sshll.u32 %s878_s27, 4  ;;  %s332_s3 = int_to_ptr.vmem [resolvable:$true] %s331_s3 }
  0x78   : > { %s329_s29 = scalar_lea.hbm %s936_s2, %s453_s21  ;;  %s319_s8 = scalar_lea.sflag [#allocation4], %s233_s4 }
  0x79   : > { %s333_s7 = sshll.u32 %s329_s29, 4  ;;  %s636_s14 = scalar_lea.hbm %s936_s2, 16  ;;  %s334_s7 = int_to_ptr.hbm [resolvable:$true] %s333_s7 }
  0x7a   : > { %s630_s12 = sshra.s32 %s334_s7, 4  ;;  %s631_s12 = int_to_ptr.hbm [resolvable:$true] %s630_s12 }
  0x7b   : > { %s632_s22 = scalar_lea.hbm %s631_s12, 8  ;;  %p637_p1 = scmp.lt.s32.totalorder %s631_s12, %s936_s2 }
  0x7c   : > { %p633_p8 = scmp.ne.s32.totalorder %s631_s12, %s632_s22  ;;  %p638_p7 = scmp.lt.s32.totalorder %s636_s14, %s632_s22 }
  0x7e   : > { %p634_p4 = pnand %p633_p8, %p809_p12  ;;  %p639_p9 = por %p638_p7, %p637_p1 }
  0x80   : > { %p635_p11 = pneg %p634_p4 }
  0x82   : > { %p640_p10 = pnand %p639_p9, %p635_p11 }
  0x84   : > { %643 = shalt.err (!%p640_p10)
}
  0x85   : > { %462 = dma.vmem_to_hbm [thread:$0]  (%p809_p12), %s332_s3, 128, %s334_s7, %s319_s8  }
  0x86 PF: > { %s345_s4 = sand.u32 1, %s695_s9   ;;  %p472_p3 = pnand %p438_p13, %p814_p0 }
  0x87   : > { %s346_s18 = scalar_lea.sflag [#allocation4], %s345_s4 }
  0x88   : > { %p473_p5 = pneg %p472_p3 }
  0x8a   : > { %689 = dma.done.wait (%p473_p5), %s346_s18, 128  }
  0x8b   : > { %691 = vsyncadd (%p473_p5), %s346_s18, 4294967168  ;;  %s21_s16 = sadd.s32 1, %s723_s16   ;;  %s943_s9 = smov %s699_s10 }
  0x8c   : > { %p18_p6 = scmp.ge.s32.totalorder %s21_s16, 4   ;;  %s944_s10 = smov %s703_s11 }
  0x8d   : > { %s945_s11 = smov %s803_s24  ;;  %s946_s12 = smov %s711_s13 }
  0x8e   : > { %s924_s13 = smov 0   ;;  %s947_s14 = smov %s719_s15 }
  0x8f   : > { %s948_s15 = smov %s950_s19  ;;  %20 = sbr.rel (!%p18_p6) target bundleno = 9 (0x9), region = 98 }
  0x94   :  { %352 = vsyncpa [#allocation3], 1 }
  0x95   :  { %354 = vsyncpa [#allocation3 + $0x1], 1 }
  0x96   :  { %355 = vsyncpa [#allocation6], 1 }
  0x97   :  { %357 = vsyncpa [#allocation6 + $0x1], 1 }
  0x98   :  { %358 = vsyncpa [#allocation4], 1 }
  0x99   :  { %360 = vsyncpa [#allocation4 + $0x1], 1 }

</bundles_post_ra>
